<compile_context>
chip_gen: v7x
topology: tpu7x:2x2x1
jax: 0.10.0
libtpu: 0.0.40
codegen_flags: <defaults>
</compile_context>

<pallas_src>
import math
import jax
import jax.numpy as jnp
from jax.experimental import pallas as pl
from jax.experimental.pallas import tpu as pltpu

# Small synthetic config (consistent with GPT2Attention: hidden divisible by heads)
B = 2          # batch
S = 8          # sequence length
D = 32         # hidden_size (embed_dim)
H = 4          # num_attention_heads
HD = D // H    # head_dim
N = B * S      # flattened rows
SCALE_ATTN_WEIGHTS = True


def gpt2_attn_kernel(x_ref, mask_ref,
                     wq_ref, wk_ref, wv_ref,
                     bq_ref, bk_ref, bv_ref,
                     wproj_ref, bproj_ref,
                     o_ref):
    """Single-invocation kernel.

    x_ref:     (N, D)       hidden states, batch*seq flattened
    mask_ref:  (N, N)       additive mask: 0 where (same batch & causal), finfo.min elsewhere
    wq/wk/wv:  (H, D, HD)   per-head c_attn weights (lane-contiguous per head)
    bq/bk/bv:  (H, 1, HD)   per-head c_attn biases
    wproj_ref: (H, HD, D)   per-head rows of c_proj weight
    bproj_ref: (1, D)       c_proj bias
    o_ref:     (N, D)       attention output
    """
    x = x_ref[...]                                   # (N, D) f32
    mask = mask_ref[...]                             # (N, N) f32 additive
    inv_scale = (jnp.float32(1.0 / math.sqrt(HD)) if SCALE_ATTN_WEIGHTS
                 else jnp.float32(1.0))

    qk_dims = (((1,), (1,)), ((), ()))               # 'nd,kd->nk' (contract head_dim)

    # Seed the accumulator with the c_proj bias (no separate epilogue add).
    acc = jnp.broadcast_to(bproj_ref[...], (N, D)).astype(jnp.float32)

    # Static unroll over heads; every per-head tensor is lane-contiguous (leading-axis
    # index, no lane-offset slicing), and the head merge happens implicitly via the summed
    # c_proj contributions.
    for h in range(H):
        q = (jnp.dot(x, wq_ref[h], preferred_element_type=jnp.float32)
             + bq_ref[h]) * inv_scale                                              # (N, HD)
        k = jnp.dot(x, wk_ref[h], preferred_element_type=jnp.float32) + bk_ref[h]  # (N, HD)
        v = jnp.dot(x, wv_ref[h], preferred_element_type=jnp.float32) + bv_ref[h]  # (N, HD)

        # Scores over all B*S rows at once; cross-batch / non-causal entries are killed
        # by the precomputed additive mask.
        s = jax.lax.dot_general(q, k, dimension_numbers=qk_dims,
                                preferred_element_type=jnp.float32) + mask          # (N, N)

        # Numerically-stable softmax; the divide goes to the EUP via approx reciprocal.
        m = jnp.max(s, axis=-1, keepdims=True)
        e = jnp.exp(s - m)
        p = e * pl.reciprocal(jnp.sum(e, axis=-1, keepdims=True), approx=True)      # (N, N)

        ah = jnp.dot(p, v, preferred_element_type=jnp.float32)                      # (N, HD)
        acc = acc + jnp.dot(ah, wproj_ref[h], preferred_element_type=jnp.float32)   # (N, D)

    o_ref[...] = acc.astype(o_ref.dtype)


def gpt2_attention(x, w_qkv, b_qkv, w_proj, b_proj):
    """x: (B, S, D) float32 -> (B, S, D) float32."""
    x2 = x.reshape(N, D)

    # One-time weight re-layout: split c_attn into lane-contiguous per-head stacks.
    w_q, w_k, w_v = jnp.split(w_qkv, 3, axis=1)                 # each (D, D)
    b_flat = b_qkv.reshape(3 * D)
    b_q, b_k, b_v = b_flat[:D], b_flat[D:2 * D], b_flat[2 * D:]

    def to_heads_w(w):                                          # (D, D) -> (H, D, HD)
        return w.reshape(D, H, HD).transpose(1, 0, 2)

    def to_heads_b(b):                                          # (D,) -> (H, 1, HD)
        return b.reshape(H, 1, HD)

    wq_h, wk_h, wv_h = to_heads_w(w_q), to_heads_w(w_k), to_heads_w(w_v)
    bq_h, bk_h, bv_h = to_heads_b(b_q), to_heads_b(b_k), to_heads_b(b_v)
    wproj_h = w_proj.reshape(H, HD, D)                          # rows h*HD:(h+1)*HD per head
    bproj = b_proj.reshape(1, D)

    # Precomputed additive block-diagonal causal mask over the flattened B*S rows
    # (same effect as GPT-2's tril bias buffer + where(..., finfo.min)).
    row = jnp.arange(N)[:, None]
    col = jnp.arange(N)[None, :]
    allowed = (row // S == col // S) & (col % S <= row % S)
    mask = jnp.where(allowed, 0.0, jnp.finfo(jnp.float32).min).astype(jnp.float32)

    out2 = pl.pallas_call(
        gpt2_attn_kernel,
        out_shape=jax.ShapeDtypeStruct((N, D), x.dtype),
        grid_spec=pltpu.PrefetchScalarGridSpec(
            num_scalar_prefetch=0,
            grid=(1,),                                          # single grid step at toy size
            in_specs=[
                pl.BlockSpec((N, D), lambda i: (0, 0)),
                pl.BlockSpec((N, N), lambda i: (0, 0)),
                pl.BlockSpec((H, D, HD), lambda i: (0, 0, 0)),
                pl.BlockSpec((H, D, HD), lambda i: (0, 0, 0)),
                pl.BlockSpec((H, D, HD), lambda i: (0, 0, 0)),
                pl.BlockSpec((H, 1, HD), lambda i: (0, 0, 0)),
                pl.BlockSpec((H, 1, HD), lambda i: (0, 0, 0)),
                pl.BlockSpec((H, 1, HD), lambda i: (0, 0, 0)),
                pl.BlockSpec((H, HD, D), lambda i: (0, 0, 0)),
                pl.BlockSpec((1, D), lambda i: (0, 0)),
            ],
            out_specs=pl.BlockSpec((N, D), lambda i: (0, 0)),
        ),
        compiler_params=pltpu.CompilerParams(
            dimension_semantics=("arbitrary",)),
    )(x2, mask, wq_h, wk_h, wv_h, bq_h, bk_h, bv_h, wproj_h, bproj)

    return out2.reshape(B, S, D)


def reference_attention(x, w_qkv, b_qkv, w_proj, b_proj):
    """Plain-JAX reference mirroring GPT2Attention._attn (eval mode)."""
    qkv = x @ w_qkv + b_qkv                                     # (B, S, 3D)
    q, k, v = jnp.split(qkv, 3, axis=-1)

    def split_heads(t):                                         # (B, S, D) -> (B, H, S, HD)
        return t.reshape(B, S, H, HD).transpose(0, 2, 1, 3)

    q, k, v = split_heads(q), split_heads(k), split_heads(v)
    scores = jnp.einsum('bhqd,bhkd->bhqk', q, k) / math.sqrt(HD)
    causal = jnp.tril(jnp.ones((S, S), dtype=bool))
    scores = jnp.where(causal[None, None], scores, jnp.finfo(jnp.float32).min)
    p = jax.nn.softmax(scores, axis=-1)
    out = jnp.einsum('bhqk,bhkd->bhqd', p, v)
    out = out.transpose(0, 2, 1, 3).reshape(B, S, D)
    return out @ w_proj + b_proj


if __name__ == "__main__":
    key = jax.random.PRNGKey(0)
    kx, k1, k2, k3, k4 = jax.random.split(key, 5)

    # Deterministic parameter init (GPT-2 style: N(0, 0.02) weights, small biases)
    x = jax.random.normal(kx, (B, S, D), dtype=jnp.float32)
    w_qkv = 0.02 * jax.random.normal(k1, (D, 3 * D), dtype=jnp.float32)
    b_qkv = 0.02 * jax.random.normal(k3, (1, 3 * D), dtype=jnp.float32)
    w_proj = 0.02 * jax.random.normal(k2, (D, D), dtype=jnp.float32)
    b_proj = 0.02 * jax.random.normal(k4, (1, D), dtype=jnp.float32)

    out = gpt2_attention(x, w_qkv, b_qkv, w_proj, b_proj)
    out = jax.block_until_ready(out)

    ref = reference_attention(x, w_qkv, b_qkv, w_proj, b_proj)
    assert out.shape == (B, S, D)
    # Slightly relaxed tolerance: softmax uses pl.reciprocal(approx=True) (~2^-12 rel err).
    assert jnp.allclose(out, ref, atol=1e-3, rtol=1e-3), "mismatch vs reference"

    print("KERNEL_OK")
</pallas_src>

<mosaic_0001>
module attributes {stable_mosaic.version = 11 : i64} {
  func.func @gpt2_attn_kernel(%arg0: i32, %arg1: memref<16x32xf32, #tpu.memory_space<vmem>>, %arg2: memref<16x16xf32, #tpu.memory_space<vmem>>, %arg3: memref<4x32x8xf32, #tpu.memory_space<vmem>>, %arg4: memref<4x32x8xf32, #tpu.memory_space<vmem>>, %arg5: memref<4x32x8xf32, #tpu.memory_space<vmem>>, %arg6: memref<4x1x8xf32, #tpu.memory_space<vmem>>, %arg7: memref<4x1x8xf32, #tpu.memory_space<vmem>>, %arg8: memref<4x1x8xf32, #tpu.memory_space<vmem>>, %arg9: memref<4x8x32xf32, #tpu.memory_space<vmem>>, %arg10: memref<1x32xf32, #tpu.memory_space<vmem>>, %arg11: memref<16x32xf32, #tpu.memory_space<vmem>>) attributes {dimension_semantics = [#tpu.dimension_semantics<arbitrary>], iteration_bounds = array<i64: 1>, scalar_prefetch = 0 : i64, scratch_operands = 0 : i64, tpu.core_type = #tpu.core_type<tc>, window_params = [{pipeline_mode = #tpu.pipeline_mode<synchronous>, transform_indices = @transform_0, window_bounds = array<i64: 16, 32>}, {pipeline_mode = #tpu.pipeline_mode<synchronous>, transform_indices = @transform_1, window_bounds = array<i64: 16, 16>}, {pipeline_mode = #tpu.pipeline_mode<synchronous>, transform_indices = @transform_2, window_bounds = array<i64: 4, 32, 8>}, {pipeline_mode = #tpu.pipeline_mode<synchronous>, transform_indices = @transform_3, window_bounds = array<i64: 4, 32, 8>}, {pipeline_mode = #tpu.pipeline_mode<synchronous>, transform_indices = @transform_4, window_bounds = array<i64: 4, 32, 8>}, {pipeline_mode = #tpu.pipeline_mode<synchronous>, transform_indices = @transform_5, window_bounds = array<i64: 4, 1, 8>}, {pipeline_mode = #tpu.pipeline_mode<synchronous>, transform_indices = @transform_6, window_bounds = array<i64: 4, 1, 8>}, {pipeline_mode = #tpu.pipeline_mode<synchronous>, transform_indices = @transform_7, window_bounds = array<i64: 4, 1, 8>}, {pipeline_mode = #tpu.pipeline_mode<synchronous>, transform_indices = @transform_8, window_bounds = array<i64: 4, 8, 32>}, {pipeline_mode = #tpu.pipeline_mode<synchronous>, transform_indices = @transform_9, window_bounds = array<i64: 1, 32>}, {pipeline_mode = #tpu.pipeline_mode<synchronous>, transform_indices = @transform_10, window_bounds = array<i64: 16, 32>}]} {
    %c0 = arith.constant 0 : index
    %c0_0 = arith.constant 0 : index
    %0 = vector.load %arg1[%c0, %c0_0] : memref<16x32xf32, #tpu.memory_space<vmem>>, vector<16x32xf32>
    %c0_1 = arith.constant 0 : index
    %c0_2 = arith.constant 0 : index
    %1 = vector.load %arg2[%c0_1, %c0_2] : memref<16x16xf32, #tpu.memory_space<vmem>>, vector<16x16xf32>
    %c0_3 = arith.constant 0 : index
    %c0_4 = arith.constant 0 : index
    %2 = vector.load %arg10[%c0_3, %c0_4] : memref<1x32xf32, #tpu.memory_space<vmem>>, vector<1x32xf32>
    %3 = vector.shape_cast %2 : vector<1x32xf32> to vector<1x32xf32>
    %4 = vector.broadcast %3 : vector<1x32xf32> to vector<16x32xf32>
    %c0_5 = arith.constant 0 : index
    %c0_6 = arith.constant 0 : index
    %c0_7 = arith.constant 0 : index
    %5 = vector.load %arg3[%c0_5, %c0_6, %c0_7] : memref<4x32x8xf32, #tpu.memory_space<vmem>>, vector<1x32x8xf32>
    %6 = vector.shape_cast %5 : vector<1x32x8xf32> to vector<32x8xf32>
    %cst = arith.constant dense<0.000000e+00> : vector<16x8xf32>
    %7 = tpu.matmul %0, %6, %cst {dimension_numbers = #tpu.dot_dimension_numbers<[1], [0], [0], [1], [0, 0, 1, 1], [], []>} : vector<16x32xf32>, vector<32x8xf32>, vector<16x8xf32> -> vector<16x8xf32>
    %c0_8 = arith.constant 0 : index
    %c0_9 = arith.constant 0 : index
    %c0_10 = arith.constant 0 : index
    %8 = vector.load %arg6[%c0_8, %c0_9, %c0_10] : memref<4x1x8xf32, #tpu.memory_space<vmem>>, vector<1x1x8xf32>
    %9 = vector.shape_cast %8 : vector<1x1x8xf32> to vector<1x8xf32>
    %10 = vector.broadcast %9 : vector<1x8xf32> to vector<16x8xf32>
    %11 = arith.addf %7, %10 : vector<16x8xf32>
    %cst_11 = arith.constant 0.353553385 : f32
    %12 = vector.broadcast %cst_11 : f32 to vector<16x8xf32>
    %13 = arith.mulf %11, %12 : vector<16x8xf32>
    %c0_12 = arith.constant 0 : index
    %c0_13 = arith.constant 0 : index
    %c0_14 = arith.constant 0 : index
    %14 = vector.load %arg4[%c0_12, %c0_13, %c0_14] : memref<4x32x8xf32, #tpu.memory_space<vmem>>, vector<1x32x8xf32>
    %15 = vector.shape_cast %14 : vector<1x32x8xf32> to vector<32x8xf32>
    %cst_15 = arith.constant dense<0.000000e+00> : vector<16x8xf32>
    %16 = tpu.matmul %0, %15, %cst_15 {dimension_numbers = #tpu.dot_dimension_numbers<[1], [0], [0], [1], [0, 0, 1, 1], [], []>} : vector<16x32xf32>, vector<32x8xf32>, vector<16x8xf32> -> vector<16x8xf32>
    %c0_16 = arith.constant 0 : index
    %c0_17 = arith.constant 0 : index
    %c0_18 = arith.constant 0 : index
    %17 = vector.load %arg7[%c0_16, %c0_17, %c0_18] : memref<4x1x8xf32, #tpu.memory_space<vmem>>, vector<1x1x8xf32>
    %18 = vector.shape_cast %17 : vector<1x1x8xf32> to vector<1x8xf32>
    %19 = vector.broadcast %18 : vector<1x8xf32> to vector<16x8xf32>
    %20 = arith.addf %16, %19 : vector<16x8xf32>
    %c0_19 = arith.constant 0 : index
    %c0_20 = arith.constant 0 : index
    %c0_21 = arith.constant 0 : index
    %21 = vector.load %arg5[%c0_19, %c0_20, %c0_21] : memref<4x32x8xf32, #tpu.memory_space<vmem>>, vector<1x32x8xf32>
    %22 = vector.shape_cast %21 : vector<1x32x8xf32> to vector<32x8xf32>
    %cst_22 = arith.constant dense<0.000000e+00> : vector<16x8xf32>
    %23 = tpu.matmul %0, %22, %cst_22 {dimension_numbers = #tpu.dot_dimension_numbers<[1], [0], [0], [1], [0, 0, 1, 1], [], []>} : vector<16x32xf32>, vector<32x8xf32>, vector<16x8xf32> -> vector<16x8xf32>
    %c0_23 = arith.constant 0 : index
    %c0_24 = arith.constant 0 : index
    %c0_25 = arith.constant 0 : index
    %24 = vector.load %arg8[%c0_23, %c0_24, %c0_25] : memref<4x1x8xf32, #tpu.memory_space<vmem>>, vector<1x1x8xf32>
    %25 = vector.shape_cast %24 : vector<1x1x8xf32> to vector<1x8xf32>
    %26 = vector.broadcast %25 : vector<1x8xf32> to vector<16x8xf32>
    %27 = arith.addf %23, %26 : vector<16x8xf32>
    %cst_26 = arith.constant dense<0.000000e+00> : vector<16x16xf32>
    %28 = tpu.matmul %13, %20, %cst_26 {dimension_numbers = #tpu.dot_dimension_numbers<[1], [1], [0], [0], [0, 0, 1, 0], [], []>} : vector<16x8xf32>, vector<16x8xf32>, vector<16x16xf32> -> vector<16x16xf32>
    %29 = arith.addf %28, %1 : vector<16x16xf32>
    %cst_27 = arith.constant dense<0xFF800000> : vector<16xf32>
    %30 = vector.multi_reduction <maximumf>, %29, %cst_27 [1] : vector<16x16xf32> to vector<16xf32>
    %31 = vector.shape_cast %30 : vector<16xf32> to vector<16x1xf32>
    %32 = vector.broadcast %31 : vector<16x1xf32> to vector<16x16xf32>
    %33 = arith.subf %29, %32 : vector<16x16xf32>
    %34 = math.exp %33 : vector<16x16xf32>
    %cst_28 = arith.constant dense<0.000000e+00> : vector<16xf32>
    %35 = vector.multi_reduction <add>, %34, %cst_28 [1] : vector<16x16xf32> to vector<16xf32>
    %36 = vector.shape_cast %35 : vector<16xf32> to vector<16x1xf32>
    %37 = tpu.reciprocal %36 {approx = true} : vector<16x1xf32> -> vector<16x1xf32>
    %38 = vector.broadcast %37 : vector<16x1xf32> to vector<16x16xf32>
    %39 = arith.mulf %34, %38 : vector<16x16xf32>
    %cst_29 = arith.constant dense<0.000000e+00> : vector<16x8xf32>
    %40 = tpu.matmul %39, %27, %cst_29 {dimension_numbers = #tpu.dot_dimension_numbers<[1], [0], [0], [1], [0, 0, 1, 1], [], []>} : vector<16x16xf32>, vector<16x8xf32>, vector<16x8xf32> -> vector<16x8xf32>
    %c0_30 = arith.constant 0 : index
    %c0_31 = arith.constant 0 : index
    %c0_32 = arith.constant 0 : index
    %41 = vector.load %arg9[%c0_30, %c0_31, %c0_32] : memref<4x8x32xf32, #tpu.memory_space<vmem>>, vector<1x8x32xf32>
    %42 = vector.shape_cast %41 : vector<1x8x32xf32> to vector<8x32xf32>
    %cst_33 = arith.constant dense<0.000000e+00> : vector<16x32xf32>
    %43 = tpu.matmul %40, %42, %cst_33 {dimension_numbers = #tpu.dot_dimension_numbers<[1], [0], [0], [1], [0, 0, 1, 1], [], []>} : vector<16x8xf32>, vector<8x32xf32>, vector<16x32xf32> -> vector<16x32xf32>
    %44 = arith.addf %4, %43 : vector<16x32xf32>
    %c1 = arith.constant 1 : index
    %c0_34 = arith.constant 0 : index
    %c0_35 = arith.constant 0 : index
    %45 = vector.load %arg3[%c1, %c0_34, %c0_35] : memref<4x32x8xf32, #tpu.memory_space<vmem>>, vector<1x32x8xf32>
    %46 = vector.shape_cast %45 : vector<1x32x8xf32> to vector<32x8xf32>
    %cst_36 = arith.constant dense<0.000000e+00> : vector<16x8xf32>
    %47 = tpu.matmul %0, %46, %cst_36 {dimension_numbers = #tpu.dot_dimension_numbers<[1], [0], [0], [1], [0, 0, 1, 1], [], []>} : vector<16x32xf32>, vector<32x8xf32>, vector<16x8xf32> -> vector<16x8xf32>
    %c1_37 = arith.constant 1 : index
    %c0_38 = arith.constant 0 : index
    %c0_39 = arith.constant 0 : index
    %48 = vector.load %arg6[%c1_37, %c0_38, %c0_39] : memref<4x1x8xf32, #tpu.memory_space<vmem>>, vector<1x1x8xf32>
    %49 = vector.shape_cast %48 : vector<1x1x8xf32> to vector<1x8xf32>
    %50 = vector.broadcast %49 : vector<1x8xf32> to vector<16x8xf32>
    %51 = arith.addf %47, %50 : vector<16x8xf32>
    %cst_40 = arith.constant 0.353553385 : f32
    %52 = vector.broadcast %cst_40 : f32 to vector<16x8xf32>
    %53 = arith.mulf %51, %52 : vector<16x8xf32>
    %c1_41 = arith.constant 1 : index
    %c0_42 = arith.constant 0 : index
    %c0_43 = arith.constant 0 : index
    %54 = vector.load %arg4[%c1_41, %c0_42, %c0_43] : memref<4x32x8xf32, #tpu.memory_space<vmem>>, vector<1x32x8xf32>
    %55 = vector.shape_cast %54 : vector<1x32x8xf32> to vector<32x8xf32>
    %cst_44 = arith.constant dense<0.000000e+00> : vector<16x8xf32>
    %56 = tpu.matmul %0, %55, %cst_44 {dimension_numbers = #tpu.dot_dimension_numbers<[1], [0], [0], [1], [0, 0, 1, 1], [], []>} : vector<16x32xf32>, vector<32x8xf32>, vector<16x8xf32> -> vector<16x8xf32>
    %c1_45 = arith.constant 1 : index
    %c0_46 = arith.constant 0 : index
    %c0_47 = arith.constant 0 : index
    %57 = vector.load %arg7[%c1_45, %c0_46, %c0_47] : memref<4x1x8xf32, #tpu.memory_space<vmem>>, vector<1x1x8xf32>
    %58 = vector.shape_cast %57 : vector<1x1x8xf32> to vector<1x8xf32>
    %59 = vector.broadcast %58 : vector<1x8xf32> to vector<16x8xf32>
    %60 = arith.addf %56, %59 : vector<16x8xf32>
    %c1_48 = arith.constant 1 : index
    %c0_49 = arith.constant 0 : index
    %c0_50 = arith.constant 0 : index
    %61 = vector.load %arg5[%c1_48, %c0_49, %c0_50] : memref<4x32x8xf32, #tpu.memory_space<vmem>>, vector<1x32x8xf32>
    %62 = vector.shape_cast %61 : vector<1x32x8xf32> to vector<32x8xf32>
    %cst_51 = arith.constant dense<0.000000e+00> : vector<16x8xf32>
    %63 = tpu.matmul %0, %62, %cst_51 {dimension_numbers = #tpu.dot_dimension_numbers<[1], [0], [0], [1], [0, 0, 1, 1], [], []>} : vector<16x32xf32>, vector<32x8xf32>, vector<16x8xf32> -> vector<16x8xf32>
    %c1_52 = arith.constant 1 : index
    %c0_53 = arith.constant 0 : index
    %c0_54 = arith.constant 0 : index
    %64 = vector.load %arg8[%c1_52, %c0_53, %c0_54] : memref<4x1x8xf32, #tpu.memory_space<vmem>>, vector<1x1x8xf32>
    %65 = vector.shape_cast %64 : vector<1x1x8xf32> to vector<1x8xf32>
    %66 = vector.broadcast %65 : vector<1x8xf32> to vector<16x8xf32>
    %67 = arith.addf %63, %66 : vector<16x8xf32>
    %cst_55 = arith.constant dense<0.000000e+00> : vector<16x16xf32>
    %68 = tpu.matmul %53, %60, %cst_55 {dimension_numbers = #tpu.dot_dimension_numbers<[1], [1], [0], [0], [0, 0, 1, 0], [], []>} : vector<16x8xf32>, vector<16x8xf32>, vector<16x16xf32> -> vector<16x16xf32>
    %69 = arith.addf %68, %1 : vector<16x16xf32>
    %cst_56 = arith.constant dense<0xFF800000> : vector<16xf32>
    %70 = vector.multi_reduction <maximumf>, %69, %cst_56 [1] : vector<16x16xf32> to vector<16xf32>
    %71 = vector.shape_cast %70 : vector<16xf32> to vector<16x1xf32>
    %72 = vector.broadcast %71 : vector<16x1xf32> to vector<16x16xf32>
    %73 = arith.subf %69, %72 : vector<16x16xf32>
    %74 = math.exp %73 : vector<16x16xf32>
    %cst_57 = arith.constant dense<0.000000e+00> : vector<16xf32>
    %75 = vector.multi_reduction <add>, %74, %cst_57 [1] : vector<16x16xf32> to vector<16xf32>
    %76 = vector.shape_cast %75 : vector<16xf32> to vector<16x1xf32>
    %77 = tpu.reciprocal %76 {approx = true} : vector<16x1xf32> -> vector<16x1xf32>
    %78 = vector.broadcast %77 : vector<16x1xf32> to vector<16x16xf32>
    %79 = arith.mulf %74, %78 : vector<16x16xf32>
    %cst_58 = arith.constant dense<0.000000e+00> : vector<16x8xf32>
    %80 = tpu.matmul %79, %67, %cst_58 {dimension_numbers = #tpu.dot_dimension_numbers<[1], [0], [0], [1], [0, 0, 1, 1], [], []>} : vector<16x16xf32>, vector<16x8xf32>, vector<16x8xf32> -> vector<16x8xf32>
    %c1_59 = arith.constant 1 : index
    %c0_60 = arith.constant 0 : index
    %c0_61 = arith.constant 0 : index
    %81 = vector.load %arg9[%c1_59, %c0_60, %c0_61] : memref<4x8x32xf32, #tpu.memory_space<vmem>>, vector<1x8x32xf32>
    %82 = vector.shape_cast %81 : vector<1x8x32xf32> to vector<8x32xf32>
    %cst_62 = arith.constant dense<0.000000e+00> : vector<16x32xf32>
    %83 = tpu.matmul %80, %82, %cst_62 {dimension_numbers = #tpu.dot_dimension_numbers<[1], [0], [0], [1], [0, 0, 1, 1], [], []>} : vector<16x8xf32>, vector<8x32xf32>, vector<16x32xf32> -> vector<16x32xf32>
    %84 = arith.addf %44, %83 : vector<16x32xf32>
    %c2 = arith.constant 2 : index
    %c0_63 = arith.constant 0 : index
    %c0_64 = arith.constant 0 : index
    %85 = vector.load %arg3[%c2, %c0_63, %c0_64] : memref<4x32x8xf32, #tpu.memory_space<vmem>>, vector<1x32x8xf32>
    %86 = vector.shape_cast %85 : vector<1x32x8xf32> to vector<32x8xf32>
    %cst_65 = arith.constant dense<0.000000e+00> : vector<16x8xf32>
    %87 = tpu.matmul %0, %86, %cst_65 {dimension_numbers = #tpu.dot_dimension_numbers<[1], [0], [0], [1], [0, 0, 1, 1], [], []>} : vector<16x32xf32>, vector<32x8xf32>, vector<16x8xf32> -> vector<16x8xf32>
    %c2_66 = arith.constant 2 : index
    %c0_67 = arith.constant 0 : index
    %c0_68 = arith.constant 0 : index
    %88 = vector.load %arg6[%c2_66, %c0_67, %c0_68] : memref<4x1x8xf32, #tpu.memory_space<vmem>>, vector<1x1x8xf32>
    %89 = vector.shape_cast %88 : vector<1x1x8xf32> to vector<1x8xf32>
    %90 = vector.broadcast %89 : vector<1x8xf32> to vector<16x8xf32>
    %91 = arith.addf %87, %90 : vector<16x8xf32>
    %cst_69 = arith.constant 0.353553385 : f32
    %92 = vector.broadcast %cst_69 : f32 to vector<16x8xf32>
    %93 = arith.mulf %91, %92 : vector<16x8xf32>
    %c2_70 = arith.constant 2 : index
    %c0_71 = arith.constant 0 : index
    %c0_72 = arith.constant 0 : index
    %94 = vector.load %arg4[%c2_70, %c0_71, %c0_72] : memref<4x32x8xf32, #tpu.memory_space<vmem>>, vector<1x32x8xf32>
    %95 = vector.shape_cast %94 : vector<1x32x8xf32> to vector<32x8xf32>
    %cst_73 = arith.constant dense<0.000000e+00> : vector<16x8xf32>
    %96 = tpu.matmul %0, %95, %cst_73 {dimension_numbers = #tpu.dot_dimension_numbers<[1], [0], [0], [1], [0, 0, 1, 1], [], []>} : vector<16x32xf32>, vector<32x8xf32>, vector<16x8xf32> -> vector<16x8xf32>
    %c2_74 = arith.constant 2 : index
    %c0_75 = arith.constant 0 : index
    %c0_76 = arith.constant 0 : index
    %97 = vector.load %arg7[%c2_74, %c0_75, %c0_76] : memref<4x1x8xf32, #tpu.memory_space<vmem>>, vector<1x1x8xf32>
    %98 = vector.shape_cast %97 : vector<1x1x8xf32> to vector<1x8xf32>
    %99 = vector.broadcast %98 : vector<1x8xf32> to vector<16x8xf32>
    %100 = arith.addf %96, %99 : vector<16x8xf32>
    %c2_77 = arith.constant 2 : index
    %c0_78 = arith.constant 0 : index
    %c0_79 = arith.constant 0 : index
    %101 = vector.load %arg5[%c2_77, %c0_78, %c0_79] : memref<4x32x8xf32, #tpu.memory_space<vmem>>, vector<1x32x8xf32>
    %102 = vector.shape_cast %101 : vector<1x32x8xf32> to vector<32x8xf32>
    %cst_80 = arith.constant dense<0.000000e+00> : vector<16x8xf32>
    %103 = tpu.matmul %0, %102, %cst_80 {dimension_numbers = #tpu.dot_dimension_numbers<[1], [0], [0], [1], [0, 0, 1, 1], [], []>} : vector<16x32xf32>, vector<32x8xf32>, vector<16x8xf32> -> vector<16x8xf32>
    %c2_81 = arith.constant 2 : index
    %c0_82 = arith.constant 0 : index
    %c0_83 = arith.constant 0 : index
    %104 = vector.load %arg8[%c2_81, %c0_82, %c0_83] : memref<4x1x8xf32, #tpu.memory_space<vmem>>, vector<1x1x8xf32>
    %105 = vector.shape_cast %104 : vector<1x1x8xf32> to vector<1x8xf32>
    %106 = vector.broadcast %105 : vector<1x8xf32> to vector<16x8xf32>
    %107 = arith.addf %103, %106 : vector<16x8xf32>
    %cst_84 = arith.constant dense<0.000000e+00> : vector<16x16xf32>
    %108 = tpu.matmul %93, %100, %cst_84 {dimension_numbers = #tpu.dot_dimension_numbers<[1], [1], [0], [0], [0, 0, 1, 0], [], []>} : vector<16x8xf32>, vector<16x8xf32>, vector<16x16xf32> -> vector<16x16xf32>
    %109 = arith.addf %108, %1 : vector<16x16xf32>
    %cst_85 = arith.constant dense<0xFF800000> : vector<16xf32>
    %110 = vector.multi_reduction <maximumf>, %109, %cst_85 [1] : vector<16x16xf32> to vector<16xf32>
    %111 = vector.shape_cast %110 : vector<16xf32> to vector<16x1xf32>
    %112 = vector.broadcast %111 : vector<16x1xf32> to vector<16x16xf32>
    %113 = arith.subf %109, %112 : vector<16x16xf32>
    %114 = math.exp %113 : vector<16x16xf32>
    %cst_86 = arith.constant dense<0.000000e+00> : vector<16xf32>
    %115 = vector.multi_reduction <add>, %114, %cst_86 [1] : vector<16x16xf32> to vector<16xf32>
    %116 = vector.shape_cast %115 : vector<16xf32> to vector<16x1xf32>
    %117 = tpu.reciprocal %116 {approx = true} : vector<16x1xf32> -> vector<16x1xf32>
    %118 = vector.broadcast %117 : vector<16x1xf32> to vector<16x16xf32>
    %119 = arith.mulf %114, %118 : vector<16x16xf32>
    %cst_87 = arith.constant dense<0.000000e+00> : vector<16x8xf32>
    %120 = tpu.matmul %119, %107, %cst_87 {dimension_numbers = #tpu.dot_dimension_numbers<[1], [0], [0], [1], [0, 0, 1, 1], [], []>} : vector<16x16xf32>, vector<16x8xf32>, vector<16x8xf32> -> vector<16x8xf32>
    %c2_88 = arith.constant 2 : index
    %c0_89 = arith.constant 0 : index
    %c0_90 = arith.constant 0 : index
    %121 = vector.load %arg9[%c2_88, %c0_89, %c0_90] : memref<4x8x32xf32, #tpu.memory_space<vmem>>, vector<1x8x32xf32>
    %122 = vector.shape_cast %121 : vector<1x8x32xf32> to vector<8x32xf32>
    %cst_91 = arith.constant dense<0.000000e+00> : vector<16x32xf32>
    %123 = tpu.matmul %120, %122, %cst_91 {dimension_numbers = #tpu.dot_dimension_numbers<[1], [0], [0], [1], [0, 0, 1, 1], [], []>} : vector<16x8xf32>, vector<8x32xf32>, vector<16x32xf32> -> vector<16x32xf32>
    %124 = arith.addf %84, %123 : vector<16x32xf32>
    %c3 = arith.constant 3 : index
    %c0_92 = arith.constant 0 : index
    %c0_93 = arith.constant 0 : index
    %125 = vector.load %arg3[%c3, %c0_92, %c0_93] : memref<4x32x8xf32, #tpu.memory_space<vmem>>, vector<1x32x8xf32>
    %126 = vector.shape_cast %125 : vector<1x32x8xf32> to vector<32x8xf32>
    %cst_94 = arith.constant dense<0.000000e+00> : vector<16x8xf32>
    %127 = tpu.matmul %0, %126, %cst_94 {dimension_numbers = #tpu.dot_dimension_numbers<[1], [0], [0], [1], [0, 0, 1, 1], [], []>} : vector<16x32xf32>, vector<32x8xf32>, vector<16x8xf32> -> vector<16x8xf32>
    %c3_95 = arith.constant 3 : index
    %c0_96 = arith.constant 0 : index
    %c0_97 = arith.constant 0 : index
    %128 = vector.load %arg6[%c3_95, %c0_96, %c0_97] : memref<4x1x8xf32, #tpu.memory_space<vmem>>, vector<1x1x8xf32>
    %129 = vector.shape_cast %128 : vector<1x1x8xf32> to vector<1x8xf32>
    %130 = vector.broadcast %129 : vector<1x8xf32> to vector<16x8xf32>
    %131 = arith.addf %127, %130 : vector<16x8xf32>
    %cst_98 = arith.constant 0.353553385 : f32
    %132 = vector.broadcast %cst_98 : f32 to vector<16x8xf32>
    %133 = arith.mulf %131, %132 : vector<16x8xf32>
    %c3_99 = arith.constant 3 : index
    %c0_100 = arith.constant 0 : index
    %c0_101 = arith.constant 0 : index
    %134 = vector.load %arg4[%c3_99, %c0_100, %c0_101] : memref<4x32x8xf32, #tpu.memory_space<vmem>>, vector<1x32x8xf32>
    %135 = vector.shape_cast %134 : vector<1x32x8xf32> to vector<32x8xf32>
    %cst_102 = arith.constant dense<0.000000e+00> : vector<16x8xf32>
    %136 = tpu.matmul %0, %135, %cst_102 {dimension_numbers = #tpu.dot_dimension_numbers<[1], [0], [0], [1], [0, 0, 1, 1], [], []>} : vector<16x32xf32>, vector<32x8xf32>, vector<16x8xf32> -> vector<16x8xf32>
    %c3_103 = arith.constant 3 : index
    %c0_104 = arith.constant 0 : index
    %c0_105 = arith.constant 0 : index
    %137 = vector.load %arg7[%c3_103, %c0_104, %c0_105] : memref<4x1x8xf32, #tpu.memory_space<vmem>>, vector<1x1x8xf32>
    %138 = vector.shape_cast %137 : vector<1x1x8xf32> to vector<1x8xf32>
    %139 = vector.broadcast %138 : vector<1x8xf32> to vector<16x8xf32>
    %140 = arith.addf %136, %139 : vector<16x8xf32>
    %c3_106 = arith.constant 3 : index
    %c0_107 = arith.constant 0 : index
    %c0_108 = arith.constant 0 : index
    %141 = vector.load %arg5[%c3_106, %c0_107, %c0_108] : memref<4x32x8xf32, #tpu.memory_space<vmem>>, vector<1x32x8xf32>
    %142 = vector.shape_cast %141 : vector<1x32x8xf32> to vector<32x8xf32>
    %cst_109 = arith.constant dense<0.000000e+00> : vector<16x8xf32>
    %143 = tpu.matmul %0, %142, %cst_109 {dimension_numbers = #tpu.dot_dimension_numbers<[1], [0], [0], [1], [0, 0, 1, 1], [], []>} : vector<16x32xf32>, vector<32x8xf32>, vector<16x8xf32> -> vector<16x8xf32>
    %c3_110 = arith.constant 3 : index
    %c0_111 = arith.constant 0 : index
    %c0_112 = arith.constant 0 : index
    %144 = vector.load %arg8[%c3_110, %c0_111, %c0_112] : memref<4x1x8xf32, #tpu.memory_space<vmem>>, vector<1x1x8xf32>
    %145 = vector.shape_cast %144 : vector<1x1x8xf32> to vector<1x8xf32>
    %146 = vector.broadcast %145 : vector<1x8xf32> to vector<16x8xf32>
    %147 = arith.addf %143, %146 : vector<16x8xf32>
    %cst_113 = arith.constant dense<0.000000e+00> : vector<16x16xf32>
    %148 = tpu.matmul %133, %140, %cst_113 {dimension_numbers = #tpu.dot_dimension_numbers<[1], [1], [0], [0], [0, 0, 1, 0], [], []>} : vector<16x8xf32>, vector<16x8xf32>, vector<16x16xf32> -> vector<16x16xf32>
    %149 = arith.addf %148, %1 : vector<16x16xf32>
    %cst_114 = arith.constant dense<0xFF800000> : vector<16xf32>
    %150 = vector.multi_reduction <maximumf>, %149, %cst_114 [1] : vector<16x16xf32> to vector<16xf32>
    %151 = vector.shape_cast %150 : vector<16xf32> to vector<16x1xf32>
    %152 = vector.broadcast %151 : vector<16x1xf32> to vector<16x16xf32>
    %153 = arith.subf %149, %152 : vector<16x16xf32>
    %154 = math.exp %153 : vector<16x16xf32>
    %cst_115 = arith.constant dense<0.000000e+00> : vector<16xf32>
    %155 = vector.multi_reduction <add>, %154, %cst_115 [1] : vector<16x16xf32> to vector<16xf32>
    %156 = vector.shape_cast %155 : vector<16xf32> to vector<16x1xf32>
    %157 = tpu.reciprocal %156 {approx = true} : vector<16x1xf32> -> vector<16x1xf32>
    %158 = vector.broadcast %157 : vector<16x1xf32> to vector<16x16xf32>
    %159 = arith.mulf %154, %158 : vector<16x16xf32>
    %cst_116 = arith.constant dense<0.000000e+00> : vector<16x8xf32>
    %160 = tpu.matmul %159, %147, %cst_116 {dimension_numbers = #tpu.dot_dimension_numbers<[1], [0], [0], [1], [0, 0, 1, 1], [], []>} : vector<16x16xf32>, vector<16x8xf32>, vector<16x8xf32> -> vector<16x8xf32>
    %c3_117 = arith.constant 3 : index
    %c0_118 = arith.constant 0 : index
    %c0_119 = arith.constant 0 : index
    %161 = vector.load %arg9[%c3_117, %c0_118, %c0_119] : memref<4x8x32xf32, #tpu.memory_space<vmem>>, vector<1x8x32xf32>
    %162 = vector.shape_cast %161 : vector<1x8x32xf32> to vector<8x32xf32>
    %cst_120 = arith.constant dense<0.000000e+00> : vector<16x32xf32>
    %163 = tpu.matmul %160, %162, %cst_120 {dimension_numbers = #tpu.dot_dimension_numbers<[1], [0], [0], [1], [0, 0, 1, 1], [], []>} : vector<16x8xf32>, vector<8x32xf32>, vector<16x32xf32> -> vector<16x32xf32>
    %164 = arith.addf %124, %163 : vector<16x32xf32>
    %c0_121 = arith.constant 0 : index
    %c0_122 = arith.constant 0 : index
    %165 = vector.load %arg11[%c0_121, %c0_122] : memref<16x32xf32, #tpu.memory_space<vmem>>, vector<16x32xf32>
    tpu.vector_store %arg11[%c0_121, %c0_122], %164 {strides = array<i32>} : memref<16x32xf32, #tpu.memory_space<vmem>>, vector<16x32xf32>,
    return
  }
  func.func @transform_0(%arg0: i32) -> (i32, i32) {
    %c0_i32 = arith.constant 0 : i32
    %c0_i32_0 = arith.constant 0 : i32
    %c0_i32_1 = arith.constant 0 : i32
    return %c0_i32, %c0_i32_0 : i32, i32
  }
  func.func @transform_1(%arg0: i32) -> (i32, i32) {
    %c0_i32 = arith.constant 0 : i32
    %c0_i32_0 = arith.constant 0 : i32
    %c0_i32_1 = arith.constant 0 : i32
    return %c0_i32, %c0_i32_0 : i32, i32
  }
  func.func @transform_2(%arg0: i32) -> (i32, i32, i32) {
    %c0_i32 = arith.constant 0 : i32
    %c0_i32_0 = arith.constant 0 : i32
    %c0_i32_1 = arith.constant 0 : i32
    %c0_i32_2 = arith.constant 0 : i32
    return %c0_i32, %c0_i32_0, %c0_i32_1 : i32, i32, i32
  }
  func.func @transform_3(%arg0: i32) -> (i32, i32, i32) {
    %c0_i32 = arith.constant 0 : i32
    %c0_i32_0 = arith.constant 0 : i32
    %c0_i32_1 = arith.constant 0 : i32
    %c0_i32_2 = arith.constant 0 : i32
    return %c0_i32, %c0_i32_0, %c0_i32_1 : i32, i32, i32
  }
  func.func @transform_4(%arg0: i32) -> (i32, i32, i32) {
    %c0_i32 = arith.constant 0 : i32
    %c0_i32_0 = arith.constant 0 : i32
    %c0_i32_1 = arith.constant 0 : i32
    %c0_i32_2 = arith.constant 0 : i32
    return %c0_i32, %c0_i32_0, %c0_i32_1 : i32, i32, i32
  }
  func.func @transform_5(%arg0: i32) -> (i32, i32, i32) {
    %c0_i32 = arith.constant 0 : i32
    %c0_i32_0 = arith.constant 0 : i32
    %c0_i32_1 = arith.constant 0 : i32
    %c0_i32_2 = arith.constant 0 : i32
    return %c0_i32, %c0_i32_0, %c0_i32_1 : i32, i32, i32
  }
  func.func @transform_6(%arg0: i32) -> (i32, i32, i32) {
    %c0_i32 = arith.constant 0 : i32
    %c0_i32_0 = arith.constant 0 : i32
    %c0_i32_1 = arith.constant 0 : i32
    %c0_i32_2 = arith.constant 0 : i32
    return %c0_i32, %c0_i32_0, %c0_i32_1 : i32, i32, i32
  }
  func.func @transform_7(%arg0: i32) -> (i32, i32, i32) {
    %c0_i32 = arith.constant 0 : i32
    %c0_i32_0 = arith.constant 0 : i32
    %c0_i32_1 = arith.constant 0 : i32
    %c0_i32_2 = arith.constant 0 : i32
    return %c0_i32, %c0_i32_0, %c0_i32_1 : i32, i32, i32
  }
  func.func @transform_8(%arg0: i32) -> (i32, i32, i32) {
    %c0_i32 = arith.constant 0 : i32
    %c0_i32_0 = arith.constant 0 : i32
    %c0_i32_1 = arith.constant 0 : i32
    %c0_i32_2 = arith.constant 0 : i32
    return %c0_i32, %c0_i32_0, %c0_i32_1 : i32, i32, i32
  }
  func.func @transform_9(%arg0: i32) -> (i32, i32) {
    %c0_i32 = arith.constant 0 : i32
    %c0_i32_0 = arith.constant 0 : i32
    %c0_i32_1 = arith.constant 0 : i32
    return %c0_i32, %c0_i32_0 : i32, i32
  }
  func.func @transform_10(%arg0: i32) -> (i32, i32) {
    %c0_i32 = arith.constant 0 : i32
    %c0_i32_0 = arith.constant 0 : i32
    %c0_i32_1 = arith.constant 0 : i32
    return %c0_i32, %c0_i32_0 : i32, i32
  }
}

</mosaic_0001>

<bundles_post_ra>
// kernel: tpu_custom_call.1
= control target key start
LH: loop header
LB: loop body
LE: loop exit
PB: predicated region body
PF: predicated region fallthrough
CT: control target
= control target key end

     0   :  { %vm58_vm0 = vcmask 261120   ;;  %s3280_s0 = inlined_call_operand.vmem [shape: f32[16,32], index: 0, kind: input, shape index: {}]   ;;  %s3281_s1 = inlined_call_operand.vmem [shape: f32[16,16], index: 1, kind: input, shape index: {}]   ;;  %s3282_s2 = inlined_call_operand.vmem [shape: f32[4,32,8], index: 2, kind: input, shape index: {}]   ;;  %s3283_s3 = inlined_call_operand.vmem [shape: f32[4,32,8], index: 3, kind: input, shape index: {}]   ;;  %s3284_s4 = inlined_call_operand.vmem [shape: f32[4,32,8], index: 4, kind: input, shape index: {}]   ;;  %s3285_s5 = inlined_call_operand.vmem [shape: f32[4,1,8], index: 5, kind: input, shape index: {}]   ;;  %s3286_s6 = inlined_call_operand.vmem [shape: f32[4,1,8], index: 6, kind: input, shape index: {}]   ;;  %s3287_s7 = inlined_call_operand.vmem [shape: f32[4,1,8], index: 7, kind: input, shape index: {}]   ;;  %s3288_s8 = inlined_call_operand.vmem [shape: f32[4,8,32], index: 8, kind: input, shape index: {}]   ;;  %s3289_s9 = inlined_call_operand.vmem [shape: f32[1,32], index: 9, kind: input, shape index: {}]   ;;  %s3290_s10 = inlined_call_operand.hbm [shape: f32[16,32], index: 10, kind: output, shape index: {}]  }
   0x1   :  { %v142_v0 = vld [vmem:[%s3283_s3] sm:$0xff]  ;;  %v143_v1 = vld [vmem:[%s3283_s3 + $0x8] sm:$0xff]  ;;  %v144_v2 = vld [vmem:[%s3283_s3 + $0x10] sm:$0xff] }
   0x2   :  { %v2680_v3 = vpack.c.bf16 %v143_v1, %v142_v0  ;;  %v145_v4 = vld [vmem:[%s3283_s3 + $0x18] sm:$0xff]  ;;  %v47_v5 = vld [vmem:[%s3282_s2] sm:$0xff]  ;;  %v48_v6 = vld [vmem:[%s3282_s2 + $0x8] sm:$0xff] }
   0x3   :  { %v2684_v7 = vpack.c.bf16 %v145_v4, %v144_v2  ;;  %v2672_v8 = vpack.c.bf16 %v48_v6, %v47_v5  ;;  %v2954_v9 = vld [vmem:[%s3280_s0] sm:$0xff]  ;;  %v49_v10 = vld [vmem:[%s3282_s2 + $0x10] sm:$0xff]  ;;  %v50_v11 = vld [vmem:[%s3282_s2 + $0x18] sm:$0xff] }
   0x4   :  { %2681 = vmatprep.subr.bf16.mxu1 %v2680_v3  ;;  %2483 = vmatprep.mubr.msk.f32.mxu1 %vm58_vm0, %v2954_v9 }
   0x5   :  { %15 = vsyncpa [#allocation3], 0  ;;  %2683 = vmatpush3.bf16.msra.mxu1 %v2680_v3  ;;  %2673 = vmatprep.subr.bf16.mxu0 %v2672_v8  ;;  %v2676_v12 = vpack.c.bf16 %v50_v11, %v49_v10  ;;  %v2969_v13 = vld [vmem:[%s3280_s0 + $0x8] sm:$0xff]  ;;  %v2235_v14 = vld [vmem:[%s3286_s6] ss:$0 sm:$0xff]  ;;  %vm314_vm1 = vcmask 64512  }
   0x6   :  { %2685 = vmatprep.subr.bf16.mxu1 %v2684_v7  ;;  %2675 = vmatpush3.bf16.msra.mxu0 %v2672_v8  ;;  %v2232_v16 = vld [vmem:[%s3285_s5] ss:$0 sm:$0xff]  ;;  %vm2985_vm2 = vmpackc.low %vm314_vm1, %vm314_vm1  ;;  %v229_v29 = vld [vmem:[%s3284_s4 + $0x8] sm:$0xff]  ;;  %vm402_vm3 = vcmask 130048   ;;  %s2875_s14 = smov [#allocation2]  }
   0x7   :  { %2677 = vmatprep.subr.bf16.mxu0 %v2676_v12  ;;  %2472 = vmatprep.mubr.msk.f32.mxu0 %vm58_vm0, %v2954_v9  ;;  %v228_v28 = vld [vmem:[%s3284_s4] sm:$0xff]  ;;  %v230_v30 = vld [vmem:[%s3284_s4 + $0x10] sm:$0xff]  ;;  %v231_v32 = vld [vmem:[%s3284_s4 + $0x18] sm:$0xff]  ;;  %s2220_s15 = sshll.u32 %s2875_s14, 4  ;;  %s2221_s15 = int_to_ptr.vmem [resolvable:$true] %s2220_s15 }
   0x8   :  { %v2688_v31 = vpack.c.bf16 %v229_v29, %v228_v28  ;;  %v2692_v33 = vpack.c.bf16 %v231_v32, %v230_v30  ;;  %v3012_v34 = vld [vmem:[%s3281_s1] sm:$0xff]  ;;  %v3017_v36 = vld [vmem:[%s3281_s1 + $0x8] sm:$0xff]  ;;  %v2252_v8 = vld [vmem:[%s3282_s2 + $0x38] sm:$0xff]  ;;  %s2851_s16 = scalar_lea.vmem %s2221_s15, 256  ;;  %p2856_p1 = scmp.lt.s32.totalorder %s2221_s15, %s2221_s15 }
   0x9   :  { %2687 = vmatpush3.bf16.msra.mxu1 %v2684_v7  ;;  %v2238_v53 = vld [vmem:[%s3287_s7] ss:$0 sm:$0xff]  ;;  %v2258_v2 = vld [vmem:[%s3283_s3 + $0x28] sm:$0xff]  ;;  %v2251_v7 = vld [vmem:[%s3282_s2 + $0x30] sm:$0xff]  ;;  %p2852_p0 = scmp.ne.s32.totalorder %s2221_s15, %s2851_s16  ;;  %p2857_p2 = scmp.lt.s32.totalorder %s2851_s16, %s2851_s16 }
   0xa   :  { %2679 = vmatpush3.bf16.msra.mxu0 %v2676_v12  ;;  %v506_v58 = vld [vmem:[%s3288_s8] sm:$0xff]  ;;  %v2250_v5 = vld [vmem:[%s3282_s2 + $0x28] sm:$0xff]  ;;  %v2710_v10 = vpack.c.bf16 %v2252_v8, %v2251_v7  ;;  %v2259_v11 = vld [vmem:[%s3283_s3 + $0x30] sm:$0xff] }
   0xb   :  { %2689 = vmatprep.subr.bf16.mxu0 %v2688_v31  ;;  %v2257_v1 = vld [vmem:[%s3283_s3 + $0x20] sm:$0xff]  ;;  %v2260_v12 = vld [vmem:[%s3283_s3 + $0x38] sm:$0xff]  ;;  %v2266_v32 = vld [vmem:[%s3284_s4 + $0x28] sm:$0xff]  ;;  %p2858_p3 = por %p2857_p2, %p2856_p1 }
   0xc   :  { %2484 = vmatmul.mubr.msk.f32.vlgmr.msra.gmra.mrb[0].mxu1 %vm58_vm0, %v2969_v13  ;;  %v2714_v3 = vpack.c.bf16 %v2258_v2, %v2257_v1  ;;  %v2249_v4 = vld [vmem:[%s3282_s2 + $0x20] sm:$0xff]  ;;  %v2283_v8 = vld [vmem:[%s3282_s2 + $0x48] sm:$0xff]  ;;  %v2334_v22 = vld [vmem:[%s3284_s4 + $0x78] sm:$0xff] }
   0xd   :  { %2473 = vmatmul.mubr.msk.f32.vlgmr.msra.gmra.mrb[0].mxu0 %vm58_vm0, %v2969_v13  ;;  %v2706_v6 = vpack.c.bf16 %v2250_v5, %v2249_v4  ;;  %v2290_v4 = vld [vmem:[%s3283_s3 + $0x40] sm:$0xff]  ;;  %v2291_v5 = vld [vmem:[%s3283_s3 + $0x48] sm:$0xff]  ;;  %p2859_p4 = pnand %p2858_p3, %p2852_p0 }
   0xe   :  { %2494 = vmatprep.mubr.msk.f32.mxu0 %vm58_vm0, %v2954_v9  ;;  %2691 = vmatpush3.bf16.msra.mxu0 %v2688_v31  ;;  %v2265_v31 = vld [vmem:[%s3284_s4 + $0x20] sm:$0xff] }
   0xf   :  { %2693 = vmatprep.subr.bf16.mxu0 %v2692_v33  ;;  %v2282_v7 = vld [vmem:[%s3282_s2 + $0x40] sm:$0xff] }
  0x12   :  { %2695 = vmatpush3.bf16.msra.mxu0 %v2692_v33  ;;  %v2267_v33 = vld [vmem:[%s3284_s4 + $0x30] sm:$0xff] }
  0x15   :  { %2495 = vmatmul.mubr.msk.f32.vlgmr.msra.gmra.mrb[2].mxu0 %vm58_vm0, %v2969_v13 }
  0xdf   :  { %v2485_v15 = vpop.f32.mrb[0].mxu1 }
  0xe0   :  { %v225_v17 = vadd.f32 %v2485_v15, %v2235_v14  ;;  %v219_v18 = vpop.f32.mrb[1].mxu1  ;;  %v2474_v19 = vpop.f32.mrb[0].mxu0 }
  0xe1   :  { %v220_v20 = vadd.f32 %v2235_v14, %v219_v18  ;;  %v131_v21 = vpop.f32.mrb[1].mxu0  ;;  %v137_v26 = vadd.f32 %v2474_v19, %v2232_v16 }
  0xe2   :  { %v132_v23 = vadd.f32 %v2232_v16, %v131_v21  ;;  %v2718_v16 = vpack.c.bf16 %v2260_v12, %v2259_v11  ;;  %v2284_v11 = vld [vmem:[%s3282_s2 + $0x50] sm:$0xff]  ;;  %v2285_v12 = vld [vmem:[%s3282_s2 + $0x58] sm:$0xff] }
  0xe3   :  { %v2696_v24 = vpack.c.bf16 %v225_v17, %v220_v20  ;;  %v141_v27 = vmul.f32 0.35355338, %v137_v26  ;;  %v2254_v17 = vld [vmem:[%s3285_s5 + $0x1] ss:$0 sm:$0xff] }
  0xe4   :  { %v140_v25 = vmul.f32 0.35355338, %v132_v23 }
  0xe5   :  { %2698 = vmatprep.subr.msk.bf16.mxu1 %vm2985_vm2, %v2696_v24 }
  0xe6   :  { %2701 = vmatpush3.bf16.xpose.msk.msra.mxu1 %vm2985_vm2, %v2696_v24  ;;  %2501 = vmatprep.mubr.msk.f32.mxu1 %vm314_vm1, %v140_v25  ;;  %v2262_v24 = vld [vmem:[%s3286_s6 + $0x1] ss:$0 sm:$0xff] }
  0xe7   :  { %2511 = vmatprep.subr.mxu1 %v506_v58 }
  0xe8   :  { %v2496_v52 = vpop.f32.mrb[2].mxu0 }
  0xe9   :  { %v305_v54 = vpop.f32.mrb[3].mxu0  ;;  %v311_v55 = vadd.f32 %v2496_v52, %v2238_v53 }
  0xea   :  { %v306_v56 = vadd.f32 %v2238_v53, %v305_v54 }
  0xec   :  { %v2702_v57 = vpack.c.bf16 %v311_v55, %v306_v56  ;;  %v2270_v56 = vld [vmem:[%s3287_s7 + $0x1] ss:$0 sm:$0xff] }
  0xed   :  { %2502 = vmatmul.mubr.msk.f32.vlgmr.msra.gmra.mrb[2].mxu1 %vm314_vm1, %v141_v27 }
  0xee   :  { %2703 = vmatprep.subr.bf16.mxu0 %v2702_v57  ;;  %2512 = vmatpush3.msra.mxu1 %v506_v58 }
  0xef   :  { %2705 = vmatpush3.bf16.msra.mxu0 %v2702_v57  ;;  %2715 = vmatprep.subr.bf16.mxu1 %v2714_v3 }
  0xf0   :  { %2707 = vmatprep.subr.bf16.mxu0 %v2706_v6 }
 0x1c0   :  { %v2503_v35 = vpop.f32.mrb[2].mxu1 }
 0x1c1   :  { %v393_v37 = vpop.f32.mrb[3].mxu1  ;;  %v399_v39 = vadd.f32 %v2503_v35, %v3017_v36  ;;  %v2722_v35 = vpack.c.bf16 %v2266_v32, %v2265_v31 }
 0x1c2   :  { %v394_v38 = vadd.f32 %v393_v37, %v3012_v34  ;;  %v2268_v37 = vld [vmem:[%s3284_s4 + $0x38] sm:$0xff] }
 0x1c3   :  { %v406_v41 = vsel %vm402_vm3, %v399_v39, -inf }
 0x1c4   :  { %v403_v40 = vsel %vm402_vm3, %v394_v38, -inf }
 0x1c5   :  { %404 = vmax.xlane.f32.xlu0 %v403_v40 }
 0x1c9   :  { %407 = vmax.xlane.f32.xlu0 %v406_v41 }
 0x252   :  { %v405_v42 = vpop.xlane.xlu0 %404 }
 0x253   :  { %v409_v43 = vsub.f32 %v394_v38, %v405_v42  ;;  %v2726_v38 = vpack.c.bf16 %v2268_v37, %v2267_v33  ;;  %v2299_v37 = vld [vmem:[%s3284_s4 + $0x48] sm:$0xff] }
 0x255   :  { %v411_v44 = vmul.f32 1.442695, %v409_v43 }
 0x256   :  { %v408_v45 = vpop.xlane.xlu0 %407 }
 0x257   :  { %2819 = vpow2.f32 %v411_v44  ;;  %v410_v46 = vsub.f32 %v399_v39, %v408_v45 }
 0x259   :  { %v413_v47 = vmul.f32 1.442695, %v410_v46 }
 0x25b   :  { %2821 = vpow2.f32 %v413_v47 }
 0x261   :  { %v2820_v48 = vpop.eup %2819 }
 0x262   :  { %v415_v49 = vsel %vm402_vm3, %v2820_v48, 0.0 }
 0x263   :  { %416 = vadd.xlane.f32.xlu1 %v415_v49 }
 0x265   :  { %v2822_v50 = vpop.eup %2821 }
 0x266   :  { %v418_v51 = vsel %vm402_vm3, %v2822_v50, 0.0 }
 0x267   :  { %419 = vadd.xlane.f32.xlu1 %v418_v51 }
 0x2f0   :  { %v417_v59 = vpop.xlane.xlu1 %416 }
 0x2f1   :  { %2823 = vrcp.f32 %v417_v59 }
 0x2f4   :  { %v420_v60 = vpop.xlane.xlu1 %419 }
 0x2f5   :  { %2825 = vrcp.f32 %v420_v60 }
 0x2fb   :  { %v2824_v61 = vpop.eup %2823 }
 0x2fc   :  { %v423_v62 = vmul.f32 %v2824_v61, %v2820_v48  ;;  %v2279_v61 = vld [vmem:[%s3288_s8 + $0x8] sm:$0xff] }
 0x2fe   :  { %2508 = vmatprep.mubr.msk.f32.mxu0 %vm402_vm3, %v423_v62 }
 0x2ff   :  { %v2826_v63 = vpop.eup %2825 }
 0x300   :  { %v424_v0 = vmul.f32 %v2826_v63, %v2822_v50 }
 0x302   :  { %2509 = vmatmul.mubr.msk.f32.vlgmr.msra.gmra.mrb[4].mxu0 %vm402_vm3, %v424_v0 }
 0x303   :  { %2524 = vmatprep.mubr.msk.f32.mxu0 %vm58_vm0, %v2954_v9  ;;  %2709 = vmatpush3.bf16.msra.mxu0 %v2706_v6  ;;  %v2748_v6 = vpack.c.bf16 %v2291_v5, %v2290_v4 }
 0x304   :  { %2711 = vmatprep.subr.bf16.mxu0 %v2710_v10 }
 0x307   :  { %2713 = vmatpush3.bf16.msra.mxu0 %v2710_v10  ;;  %v2740_v10 = vpack.c.bf16 %v2283_v8, %v2282_v7  ;;  %v2323_v7 = vld [vmem:[%s3283_s3 + $0x60] sm:$0xff]  ;;  %v2324_v8 = vld [vmem:[%s3283_s3 + $0x68] sm:$0xff] }
 0x308   :  { %2723 = vmatprep.subr.bf16.mxu0 %v2722_v35 }
 0x30a   :  { %2525 = vmatmul.mubr.msk.f32.vlgmr.msra.gmra.mrb[6].mxu0 %vm58_vm0, %v2969_v13 }
 0x30b   :  { %2546 = vmatprep.mubr.msk.f32.mxu0 %vm58_vm0, %v2954_v9  ;;  %2725 = vmatpush3.bf16.msra.mxu0 %v2722_v35  ;;  %v2298_v35 = vld [vmem:[%s3284_s4 + $0x40] sm:$0xff] }
 0x30c   :  { %2727 = vmatprep.subr.bf16.mxu0 %v2726_v38 }
 0x30f   :  { %2729 = vmatpush3.bf16.msra.mxu0 %v2726_v38  ;;  %v2300_v38 = vld [vmem:[%s3284_s4 + $0x50] sm:$0xff] }
 0x312   :  { %2547 = vmatmul.mubr.msk.f32.vlgmr.msra.gmra.mrb[8].mxu0 %vm58_vm0, %v2969_v13 }
 0x3d5   :  { %v2510_v14 = vpop.f32.mrb[4].mxu0 }
 0x3d6   :  { %v497_v15 = vpop.f32.mrb[5].mxu0 }
 0x3d7   :  { %2513 = vmatprep.mubr.msk.f32.mxu1 %vm314_vm1, %v497_v15  ;;  %v2292_v15 = vld [vmem:[%s3283_s3 + $0x50] sm:$0xff] }
 0x3d8   :  { %2514 = vmatmul.mubr.msk.f32.vlgmr.msra.gmra.mrb[4].mxu1 %vm314_vm1, %v2510_v14  ;;  %v2744_v14 = vpack.c.bf16 %v2285_v12, %v2284_v11  ;;  %v2315_v11 = vld [vmem:[%s3282_s2 + $0x60] sm:$0xff]  ;;  %v2316_v12 = vld [vmem:[%s3282_s2 + $0x68] sm:$0xff] }
 0x3d9   :  { %2717 = vmatpush3.bf16.msra.mxu1 %v2714_v3  ;;  %2535 = vmatprep.mubr.msk.f32.mxu1 %vm58_vm0, %v2954_v9 }
 0x3da   :  { %2719 = vmatprep.subr.bf16.mxu1 %v2718_v16 }
 0x3dd   :  { %2721 = vmatpush3.bf16.msra.mxu1 %v2718_v16  ;;  %v2526_v18 = vpop.f32.mrb[6].mxu0  ;;  %v2293_v16 = vld [vmem:[%s3283_s3 + $0x58] sm:$0xff] }
 0x3de   :  { %v675_v19 = vadd.f32 %v2526_v18, %v2254_v17  ;;  %v669_v20 = vpop.f32.mrb[7].mxu0 }
 0x3df   :  { %v670_v21 = vadd.f32 %v2254_v17, %v669_v20  ;;  %v2287_v20 = vld [vmem:[%s3285_s5 + $0x2] ss:$0 sm:$0xff] }
 0x3e0   :  { %2536 = vmatmul.mubr.msk.f32.vlgmr.msra.gmra.mrb[6].mxu1 %vm58_vm0, %v2969_v13  ;;  %v679_v30 = vmul.f32 0.35355338, %v675_v19  ;;  %v2752_v19 = vpack.c.bf16 %v2293_v16, %v2292_v15  ;;  %v2317_v15 = vld [vmem:[%s3282_s2 + $0x70] sm:$0xff]  ;;  %v2318_v16 = vld [vmem:[%s3282_s2 + $0x78] sm:$0xff] }
 0x3e1   :  { %v678_v23 = vmul.f32 0.35355338, %v670_v21 }
 0x3e3   :  { %2553 = vmatprep.mubr.msk.f32.mxu1 %vm314_vm1, %v678_v23 }
 0x3e5   :  { %v2548_v55 = vpop.f32.mrb[8].mxu0 }
 0x3e6   :  { %v847_v57 = vpop.f32.mrb[9].mxu0  ;;  %v853_v58 = vadd.f32 %v2548_v55, %v2270_v56 }
 0x3e7   :  { %v848_v59 = vadd.f32 %v2270_v56, %v847_v57 }
 0x3e9   :  { %v2736_v60 = vpack.c.bf16 %v853_v58, %v848_v59  ;;  %v2303_v59 = vld [vmem:[%s3287_s7 + $0x2] ss:$0 sm:$0xff] }
 0x3eb   :  { %2737 = vmatprep.subr.bf16.mxu0 %v2736_v60 }
 0x3ec   :  { %2739 = vmatpush3.bf16.msra.mxu0 %v2736_v60 }
 0x3ed   :  { %2741 = vmatprep.subr.bf16.mxu0 %v2740_v10 }
 0x4b3   :  { %v2537_v25 = vpop.f32.mrb[6].mxu1 }
 0x4b4   :  { %v765_v26 = vadd.f32 %v2537_v25, %v2262_v24  ;;  %v759_v27 = vpop.f32.mrb[7].mxu1 }
 0x4b5   :  { %v760_v28 = vadd.f32 %v2262_v24, %v759_v27  ;;  %v2295_v27 = vld [vmem:[%s3286_s6 + $0x2] ss:$0 sm:$0xff] }
 0x4b7   :  { %v2730_v29 = vpack.c.bf16 %v765_v26, %v760_v28 }
 0x4b9   :  { %2732 = vmatprep.subr.msk.bf16.mxu1 %vm2985_vm2, %v2730_v29 }
 0x4ba   :  { %2735 = vmatpush3.bf16.xpose.msk.msra.mxu1 %vm2985_vm2, %v2730_v29 }
 0x4bb   :  { %2563 = vmatprep.subr.mxu1 %v2279_v61 }
 0x4c1   :  { %2554 = vmatmul.mubr.msk.f32.vlgmr.msra.gmra.mrb[8].mxu1 %vm314_vm1, %v679_v30 }
 0x4c2   :  { %2564 = vmatpush3.msra.mxu1 %v2279_v61 }
 0x4c3   :  { %2749 = vmatprep.subr.bf16.mxu1 %v2748_v6 }
 0x594   :  { %v2555_v39 = vpop.f32.mrb[8].mxu1 }
 0x595   :  { %v940_v40 = vadd.f32 %v2555_v39, %v3017_v36  ;;  %v934_v41 = vpop.f32.mrb[9].mxu1  ;;  %v2756_v39 = vpack.c.bf16 %v2299_v37, %v2298_v35 }
 0x596   :  { %v935_v42 = vadd.f32 %v934_v41, %v3012_v34 }
 0x597   :  { %v946_v43 = vsel %vm402_vm3, %v940_v40, -inf }
 0x598   :  { %947 = vmax.xlane.f32.xlu1 %v946_v43  ;;  %v943_v44 = vsel %vm402_vm3, %v935_v42, -inf }
 0x599   :  { %944 = vmax.xlane.f32.xlu0 %v943_v44 }
 0x625   :  { %v948_v45 = vpop.xlane.xlu1 %947 }
 0x626   :  { %v950_v46 = vsub.f32 %v940_v40, %v948_v45  ;;  %v945_v47 = vpop.xlane.xlu0 %944  ;;  %v2301_v40 = vld [vmem:[%s3284_s4 + $0x58] sm:$0xff] }
 0x627   :  { %v949_v48 = vsub.f32 %v935_v42, %v945_v47  ;;  %v2760_v41 = vpack.c.bf16 %v2301_v40, %v2300_v38  ;;  %v2331_v38 = vld [vmem:[%s3284_s4 + $0x60] sm:$0xff]  ;;  %v2333_v40 = vld [vmem:[%s3284_s4 + $0x70] sm:$0xff] }
 0x628   :  { %v953_v49 = vmul.f32 1.442695, %v950_v46 }
 0x629   :  { %v951_v50 = vmul.f32 1.442695, %v949_v48 }
 0x62a   :  { %2827 = vpow2.f32 %v953_v49 }
 0x62b   :  { %2829 = vpow2.f32 %v951_v50 }
 0x634   :  { %v2828_v51 = vpop.eup %2827 }
 0x635   :  { %v2830_v52 = vpop.eup %2829  ;;  %v958_v53 = vsel %vm402_vm3, %v2828_v51, 0.0 }
 0x636   :  { %959 = vadd.xlane.f32.xlu1 %v958_v53  ;;  %v955_v54 = vsel %vm402_vm3, %v2830_v52, 0.0 }
 0x637   :  { %956 = vadd.xlane.f32.xlu0 %v955_v54 }
 0x6c3   :  { %v960_v62 = vpop.xlane.xlu1 %959 }
 0x6c4   :  { %2831 = vrcp.f32 %v960_v62  ;;  %v957_v63 = vpop.xlane.xlu0 %956 }
 0x6c5   :  { %2833 = vrcp.f32 %v957_v63 }
 0x6ce   :  { %v2832_v0 = vpop.eup %2831 }
 0x6cf   :  { %v2834_v1 = vpop.eup %2833  ;;  %v964_v3 = vmul.f32 %v2832_v0, %v2828_v51  ;;  %v2312_v0 = vld [vmem:[%s3288_s8 + $0x10] sm:$0xff] }
 0x6d0   :  { %v963_v2 = vmul.f32 %v2834_v1, %v2830_v52 }
 0x6d2   :  { %2560 = vmatprep.mubr.msk.f32.mxu0 %vm402_vm3, %v963_v2 }
 0x6d3   :  { %2561 = vmatmul.mubr.msk.f32.vlgmr.msra.gmra.mrb[10].mxu0 %vm402_vm3, %v964_v3 }
 0x6d4   :  { %2576 = vmatprep.mubr.msk.f32.mxu0 %vm58_vm0, %v2954_v9  ;;  %2743 = vmatpush3.bf16.msra.mxu0 %v2740_v10  ;;  %v2782_v10 = vpack.c.bf16 %v2324_v8, %v2323_v7  ;;  %v2231_v7 = vld [vmem:[%s3289_s9] ss:$0 sm:$0xff] }
 0x6d5   :  { %2745 = vmatprep.subr.bf16.mxu0 %v2744_v14 }
 0x6d8   :  { %2747 = vmatpush3.bf16.msra.mxu0 %v2744_v14  ;;  %v2774_v14 = vpack.c.bf16 %v2316_v12, %v2315_v11 }
 0x6d9   :  { %2757 = vmatprep.subr.bf16.mxu0 %v2756_v39 }
 0x6db   :  { %2577 = vmatmul.mubr.msk.f32.vlgmr.msra.gmra.mrb[12].mxu0 %vm58_vm0, %v2969_v13 }
 0x6dc   :  { %2598 = vmatprep.mubr.msk.f32.mxu0 %vm58_vm0, %v2954_v9  ;;  %2759 = vmatpush3.bf16.msra.mxu0 %v2756_v39  ;;  %v2332_v39 = vld [vmem:[%s3284_s4 + $0x68] sm:$0xff] }
 0x6dd   :  { %2761 = vmatprep.subr.bf16.mxu0 %v2760_v41 }
 0x6e0   :  { %2763 = vmatpush3.bf16.msra.mxu0 %v2760_v41  ;;  %v2790_v41 = vpack.c.bf16 %v2332_v39, %v2331_v38 }
 0x6e3   :  { %2599 = vmatmul.mubr.msk.f32.vlgmr.msra.gmra.mrb[14].mxu0 %vm58_vm0, %v2969_v13 }
 0x7a6   :  { %v2562_v17 = vpop.f32.mrb[10].mxu0 }
 0x7a7   :  { %v1037_v18 = vpop.f32.mrb[11].mxu0 }
 0x7a8   :  { %2565 = vmatprep.mubr.msk.f32.mxu1 %vm314_vm1, %v1037_v18  ;;  %v2325_v18 = vld [vmem:[%s3283_s3 + $0x70] sm:$0xff] }
 0x7a9   :  { %2566 = vmatmul.mubr.msk.f32.vlgmr.msra.gmra.mrb[4].mxu1 %vm314_vm1, %v2562_v17  ;;  %v2778_v17 = vpack.c.bf16 %v2318_v16, %v2317_v15 }
 0x7aa   :  { %2751 = vmatpush3.bf16.msra.mxu1 %v2748_v6  ;;  %2587 = vmatprep.mubr.msk.f32.mxu1 %vm58_vm0, %v2954_v9 }
 0x7ab   :  { %2753 = vmatprep.subr.bf16.mxu1 %v2752_v19 }
 0x7ae   :  { %2755 = vmatpush3.bf16.msra.mxu1 %v2752_v19  ;;  %v2578_v21 = vpop.f32.mrb[12].mxu0  ;;  %v2326_v19 = vld [vmem:[%s3283_s3 + $0x78] sm:$0xff] }
 0x7af   :  { %v1216_v23 = vadd.f32 %v2578_v21, %v2287_v20  ;;  %v1210_v24 = vpop.f32.mrb[13].mxu0 }
 0x7b0   :  { %v1211_v25 = vadd.f32 %v2287_v20, %v1210_v24  ;;  %v2320_v24 = vld [vmem:[%s3285_s5 + $0x3] ss:$0 sm:$0xff] }
 0x7b1   :  { %2588 = vmatmul.mubr.msk.f32.vlgmr.msra.gmra.mrb[10].mxu1 %vm58_vm0, %v2969_v13  ;;  %v1220_v33 = vmul.f32 0.35355338, %v1216_v23  ;;  %v2786_v23 = vpack.c.bf16 %v2326_v19, %v2325_v18 }
 0x7b2   :  { %v1219_v26 = vmul.f32 0.35355338, %v1211_v25 }
 0x7b4   :  { %2605 = vmatprep.mubr.msk.f32.mxu1 %vm314_vm1, %v1219_v26 }
 0x7b6   :  { %v2600_v58 = vpop.f32.mrb[14].mxu0 }
 0x7b7   :  { %v1388_v60 = vpop.f32.mrb[15].mxu0  ;;  %v1394_v61 = vadd.f32 %v2600_v58, %v2303_v59 }
 0x7b8   :  { %v1389_v62 = vadd.f32 %v2303_v59, %v1388_v60 }
 0x7ba   :  { %v2770_v63 = vpack.c.bf16 %v1394_v61, %v1389_v62  ;;  %v2345_v62 = vld [vmem:[%s3288_s8 + $0x18] sm:$0xff] }
 0x7bc   :  { %2771 = vmatprep.subr.bf16.mxu0 %v2770_v63 }
 0x7bd   :  { %2773 = vmatpush3.bf16.msra.mxu0 %v2770_v63 }
 0x7be   :  { %2775 = vmatprep.subr.bf16.mxu0 %v2774_v14 }
 0x884   :  { %v2589_v28 = vpop.f32.mrb[10].mxu1 }
 0x885   :  { %v1306_v29 = vadd.f32 %v2589_v28, %v2295_v27  ;;  %v1300_v30 = vpop.f32.mrb[11].mxu1 }
 0x886   :  { %v1301_v31 = vadd.f32 %v2295_v27, %v1300_v30 }
 0x888   :  { %v2764_v32 = vpack.c.bf16 %v1306_v29, %v1301_v31 }
 0x88a   :  { %2766 = vmatprep.subr.msk.bf16.mxu1 %vm2985_vm2, %v2764_v32 }
 0x88b   :  { %2769 = vmatpush3.bf16.xpose.msk.msra.mxu1 %vm2985_vm2, %v2764_v32 }
 0x88c   :  { %2615 = vmatprep.subr.mxu1 %v2312_v0 }
 0x892   :  { %2606 = vmatmul.mubr.msk.f32.vlgmr.msra.gmra.mrb[12].mxu1 %vm314_vm1, %v1220_v33 }
 0x893   :  { %2616 = vmatpush3.msra.mxu1 %v2312_v0 }
 0x894   :  { %2783 = vmatprep.subr.bf16.mxu1 %v2782_v10 }
 0x965   :  { %v2607_v42 = vpop.f32.mrb[12].mxu1 }
 0x966   :  { %v1481_v43 = vadd.f32 %v2607_v42, %v3017_v36  ;;  %v1475_v44 = vpop.f32.mrb[13].mxu1  ;;  %v2794_v42 = vpack.c.bf16 %v2334_v22, %v2333_v40 }
 0x967   :  { %v1476_v45 = vadd.f32 %v1475_v44, %v3012_v34 }
 0x968   :  { %v1487_v46 = vsel %vm402_vm3, %v1481_v43, -inf }
 0x969   :  { %1488 = vmax.xlane.f32.xlu1 %v1487_v46  ;;  %v1484_v47 = vsel %vm402_vm3, %v1476_v45, -inf }
 0x96a   :  { %1485 = vmax.xlane.f32.xlu0 %v1484_v47 }
 0x9f6   :  { %v1489_v48 = vpop.xlane.xlu1 %1488 }
 0x9f7   :  { %v1491_v49 = vsub.f32 %v1481_v43, %v1489_v48  ;;  %v1486_v50 = vpop.xlane.xlu0 %1485 }
 0x9f8   :  { %v1490_v51 = vsub.f32 %v1476_v45, %v1486_v50 }
 0x9f9   :  { %v1494_v52 = vmul.f32 1.442695, %v1491_v49 }
 0x9fa   :  { %v1492_v53 = vmul.f32 1.442695, %v1490_v51 }
 0x9fb   :  { %2835 = vpow2.f32 %v1494_v52 }
 0x9fc   :  { %2837 = vpow2.f32 %v1492_v53 }
 0xa05   :  { %v2836_v54 = vpop.eup %2835 }
 0xa06   :  { %v2838_v55 = vpop.eup %2837  ;;  %v1499_v56 = vsel %vm402_vm3, %v2836_v54, 0.0 }
 0xa07   :  { %1500 = vadd.xlane.f32.xlu1 %v1499_v56  ;;  %v1496_v57 = vsel %vm402_vm3, %v2838_v55, 0.0 }
 0xa08   :  { %1497 = vadd.xlane.f32.xlu0 %v1496_v57  ;;  %v2336_v57 = vld [vmem:[%s3287_s7 + $0x3] ss:$0 sm:$0xff] }
 0xa94   :  { %v1501_v1 = vpop.xlane.xlu1 %1500 }
 0xa95   :  { %2839 = vrcp.f32 %v1501_v1  ;;  %v1498_v2 = vpop.xlane.xlu0 %1497 }
 0xa96   :  { %2841 = vrcp.f32 %v1498_v2 }
 0xa9f   :  { %v2840_v3 = vpop.eup %2839 }
 0xaa0   :  { %v2842_v4 = vpop.eup %2841  ;;  %v1505_v6 = vmul.f32 %v2840_v3, %v2836_v54 }
 0xaa1   :  { %v1504_v5 = vmul.f32 %v2842_v4, %v2838_v55 }
 0xaa3   :  { %2612 = vmatprep.mubr.msk.f32.mxu0 %vm402_vm3, %v1504_v5 }
 0xaa4   :  { %2613 = vmatmul.mubr.msk.f32.vlgmr.msra.gmra.mrb[16].mxu0 %vm402_vm3, %v1505_v6 }
 0xaa5   :  { %2628 = vmatprep.mubr.msk.f32.mxu0 %vm58_vm0, %v2954_v9  ;;  %2777 = vmatpush3.bf16.msra.mxu0 %v2774_v14 }
 0xaa6   :  { %2779 = vmatprep.subr.bf16.mxu0 %v2778_v17 }
 0xaa9   :  { %2781 = vmatpush3.bf16.msra.mxu0 %v2778_v17 }
 0xaaa   :  { %2791 = vmatprep.subr.bf16.mxu0 %v2790_v41 }
 0xaac   :  { %2629 = vmatmul.mubr.msk.f32.vlgmr.msra.gmra.mrb[18].mxu0 %vm58_vm0, %v2969_v13 }
 0xaad   :  { %2650 = vmatprep.mubr.msk.f32.mxu0 %vm58_vm0, %v2954_v9  ;;  %2793 = vmatpush3.bf16.msra.mxu0 %v2790_v41 }
 0xaae   :  { %2795 = vmatprep.subr.bf16.mxu0 %v2794_v42 }
 0xab1   :  { %2797 = vmatpush3.bf16.msra.mxu0 %v2794_v42 }
 0xab4   :  { %2651 = vmatmul.mubr.msk.f32.vlgmr.msra.gmra.mrb[20].mxu0 %vm58_vm0, %v2969_v13 }
 0xb77   :  { %v2614_v20 = vpop.f32.mrb[16].mxu0 }
 0xb78   :  { %v1578_v21 = vpop.f32.mrb[17].mxu0 }
 0xb79   :  { %2617 = vmatprep.mubr.msk.f32.mxu1 %vm314_vm1, %v1578_v21 }
 0xb7a   :  { %2618 = vmatmul.mubr.msk.f32.vlgmr.msra.gmra.mrb[4].mxu1 %vm314_vm1, %v2614_v20 }
 0xb7b   :  { %2785 = vmatpush3.bf16.msra.mxu1 %v2782_v10  ;;  %2639 = vmatprep.mubr.msk.f32.mxu1 %vm58_vm0, %v2954_v9  ;;  %v2328_v9 = vld [vmem:[%s3286_s6 + $0x3] ss:$0 sm:$0xff] }
 0xb7c   :  { %2787 = vmatprep.subr.bf16.mxu1 %v2786_v23 }
 0xb7f   :  { %2789 = vmatpush3.bf16.msra.mxu1 %v2786_v23  ;;  %v2630_v25 = vpop.f32.mrb[18].mxu0 }
 0xb80   :  { %v1757_v26 = vadd.f32 %v2630_v25, %v2320_v24  ;;  %v1751_v27 = vpop.f32.mrb[19].mxu0 }
 0xb81   :  { %v1752_v28 = vadd.f32 %v2320_v24, %v1751_v27 }
 0xb82   :  { %2640 = vmatmul.mubr.msk.f32.vlgmr.msra.gmra.mrb[14].mxu1 %vm58_vm0, %v2969_v13  ;;  %v1761_v37 = vmul.f32 0.35355338, %v1757_v26 }
 0xb83   :  { %v1760_v29 = vmul.f32 0.35355338, %v1752_v28 }
 0xb85   :  { %2657 = vmatprep.mubr.msk.f32.mxu1 %vm314_vm1, %v1760_v29 }
 0xb87   :  { %v2652_v56 = vpop.f32.mrb[20].mxu0 }
 0xb88   :  { %v1929_v58 = vpop.f32.mrb[21].mxu0  ;;  %v1935_v59 = vadd.f32 %v2652_v56, %v2336_v57 }
 0xb89   :  { %v1930_v60 = vadd.f32 %v2336_v57, %v1929_v58 }
 0xb8b   :  { %v2804_v61 = vpack.c.bf16 %v1935_v59, %v1930_v60 }
 0xb8d   :  { %2805 = vmatprep.subr.bf16.mxu0 %v2804_v61 }
 0xb8e   :  { %2807 = vmatpush3.bf16.msra.mxu0 %v2804_v61 }
 0xc55   :  { %v2641_v30 = vpop.f32.mrb[14].mxu1 }
 0xc56   :  { %v1847_v31 = vadd.f32 %v2641_v30, %v2328_v9  ;;  %v1841_v32 = vpop.f32.mrb[15].mxu1 }
 0xc57   :  { %v1842_v33 = vadd.f32 %v2328_v9, %v1841_v32 }
 0xc59   :  { %v2798_v35 = vpack.c.bf16 %v1847_v31, %v1842_v33 }
 0xc5b   :  { %2800 = vmatprep.subr.msk.bf16.mxu1 %vm2985_vm2, %v2798_v35 }
 0xc5c   :  { %2803 = vmatpush3.bf16.xpose.msk.msra.mxu1 %vm2985_vm2, %v2798_v35 }
 0xc5d   :  { %2667 = vmatprep.subr.mxu1 %v2345_v62 }
 0xc63   :  { %2658 = vmatmul.mubr.msk.f32.vlgmr.msra.gmra.mrb[16].mxu1 %vm314_vm1, %v1761_v37 }
 0xc64   :  { %2668 = vmatpush3.msra.mxu1 %v2345_v62 }
 0xd36   :  { %v2659_v43 = vpop.f32.mrb[16].mxu1 }
 0xd37   :  { %v2022_v44 = vadd.f32 %v2659_v43, %v3017_v36  ;;  %v2016_v45 = vpop.f32.mrb[17].mxu1 }
 0xd38   :  { %v2017_v46 = vadd.f32 %v2016_v45, %v3012_v34 }
 0xd39   :  { %v2028_v47 = vsel %vm402_vm3, %v2022_v44, -inf }
 0xd3a   :  { %2029 = vmax.xlane.f32.xlu1 %v2028_v47  ;;  %v2025_v48 = vsel %vm402_vm3, %v2017_v46, -inf }
 0xd3b   :  { %2026 = vmax.xlane.f32.xlu0 %v2025_v48 }
 0xdc7   :  { %v2030_v49 = vpop.xlane.xlu1 %2029 }
 0xdc8   :  { %v2032_v50 = vsub.f32 %v2022_v44, %v2030_v49  ;;  %v2027_v51 = vpop.xlane.xlu0 %2026 }
 0xdc9   :  { %v2031_v52 = vsub.f32 %v2017_v46, %v2027_v51 }
 0xdca   :  { %v2035_v53 = vmul.f32 1.442695, %v2032_v50 }
 0xdcb   :  { %v2033_v54 = vmul.f32 1.442695, %v2031_v52 }
 0xdcc   :  { %2843 = vpow2.f32 %v2035_v53 }
 0xdcd   :  { %2845 = vpow2.f32 %v2033_v54 }
 0xdd6   :  { %v2844_v13 = vpop.eup %2843 }
 0xdd7   :  { %v2846_v55 = vpop.eup %2845  ;;  %v2040_v36 = vsel %vm402_vm3, %v2844_v13, 0.0 }
 0xdd8   :  { %2041 = vadd.xlane.f32.xlu1 %v2040_v36  ;;  %v2037_v34 = vsel %vm402_vm3, %v2846_v55, 0.0 }
 0xdd9   :  { %2038 = vadd.xlane.f32.xlu0 %v2037_v34 }
 0xe65   :  { %v2042_v63 = vpop.xlane.xlu1 %2041 }
 0xe66   :  { %2847 = vrcp.f32 %v2042_v63  ;;  %v2039_v0 = vpop.xlane.xlu0 %2038 }
 0xe67   :  { %2849 = vrcp.f32 %v2039_v0 }
 0xe70   :  { %v2848_v1 = vpop.eup %2847 }
 0xe71   :  { %v2850_v2 = vpop.eup %2849  ;;  %v2046_v4 = vmul.f32 %v2848_v1, %v2844_v13 }
 0xe72   :  { %v2045_v3 = vmul.f32 %v2850_v2, %v2846_v55 }
 0xe74   :  { %2664 = vmatprep.mubr.msk.f32.mxu0 %vm402_vm3, %v2045_v3 }
 0xe75   :  { %2665 = vmatmul.mubr.msk.f32.vlgmr.msra.gmra.mrb[22].mxu0 %vm402_vm3, %v2046_v4 }
 0xf48   :  { %v2666_v5 = vpop.f32.mrb[22].mxu0 }
 0xf49   :  { %v2119_v6 = vpop.f32.mrb[23].mxu0 }
 0xf4a   :  { %2669 = vmatprep.mubr.msk.f32.mxu1 %vm314_vm1, %v2119_v6 }
 0xf4b   :  { %2670 = vmatmul.mubr.msk.f32.vlgmr.msra.gmra.mrb[4].mxu1 %vm314_vm1, %v2666_v5 }
0x101e   :  { %v2671_v8 = vpop.f32.mrb[4].mxu1 }
0x101f   :  { %v2808_v10 = vadd.f32 %v2671_v8, %v2231_v7  ;;  %v2202_v11 = vpop.f32.mrb[5].mxu1 }
0x1020   :  { %v2809_v12 = vadd.f32 %v2231_v7, %v2202_v11 }
0x1021   :  { %2214 = vst.msk [vmem:[#allocation2 + $0x8] sm:$0xff] %vm58_vm0, %v2808_v10 }
0x1022   :  { %2213 = vst.msk [vmem:[#allocation2] sm:$0xff] %vm58_vm0, %v2809_v12 }
0x1023   :  { %2862 = shalt.err (!%p2859_p4)
}
0x1024   :  { %s2863_s17 = scalar_lea.hbm %s3290_s10, 256 }
0x1025   :  { %p2864_p5 = scmp.ne.s32.totalorder %s3290_s10, %s2863_s17  ;;  %p2867_p6 = scmp.lt.u32.totalorder %s2863_s17, %s3290_s10 }
0x1027   :  { %p2869_p7 = pnand %p2867_p6, %p2864_p5 }
0x1029   :  { %2872 = shalt.err (!%p2869_p7)
}
0x102a   :  { %s2876_s22 = smov 128   ;;  %s2877_s23 = smov 8  }
0x102b   :  { %2226 = dma.vmem_to_hbm [thread:$0]  %s2221_s15, 256, %s3290_s10, [#allocation3], %s2876_s22, %s2876_s22, %s2877_s23  }
0x102c   :  { %2873 = dma.done.wait [#allocation3], 256  }
0x102d   :  { %2874 = vsyncadd [#allocation3], 4294967040 }
0x102e   :  { %2230 = vsyncpa [#allocation3], 1 }

</bundles_post_ra>
